<compile_context>
chip_gen: v5e
topology: v5e:2x2
jax: 0.10.0
libtpu: 0.0.40
codegen_flags: <defaults>
</compile_context>

<pallas_src>
import jax
import jax.numpy as jnp
from jax import lax
from jax.experimental import pallas as pl
from jax.experimental.pallas import tpu as pltpu

C_IN, C_OUT, KH, KW = 3, 6, 3, 3
STRIDE, PAD, DIL = 3, 1, 2


def _round_up(x, m):
    return ((x + m - 1) // m) * m


def _fused_conv_kernel(a_ref, w_ref, o_ref):
    # a_ref: (K_pad, NM_pad)   im2col patches + a constant-1 bias row,
    #                          K on sublanes, (batch*spatial) lane-dense
    # w_ref: (CO_pad, K_pad)   flattened conv weight; bias folded into column K
    # o_ref: (CO_pad, NM_pad)  lane-dense output (full, unmasked vst)
    t1 = jnp.dot(w_ref[...], a_ref[...],
                 preferred_element_type=jnp.float32)       # conv + bias
    # (t1 + 2) * clip(t1/2, 0, 6) * 6  ==  (t1 + 2) * clip(3*t1, 0, 36)
    t3 = jnp.clip(t1 * 3.0, 0.0, 36.0)
    o_ref[...] = (t1 + 2.0) * t3


@jax.jit
def model_forward(x, weight, bias):
    """x: (N, C_IN, H, W) f32; weight: (C_OUT, C_IN, KH, KW); bias: (C_OUT,)."""
    N, C, H, W = x.shape
    OH = (H + 2 * PAD - DIL * (KH - 1) - 1) // STRIDE + 1
    OW = (W + 2 * PAD - DIL * (KW - 1) - 1) // STRIDE + 1
    K = C * KH * KW
    M = OH * OW
    NM = N * M

    # ---- glue: im2col patch extraction, built directly in (K, N*M) orientation ----
    # TODO(synk): strided (stride=3) lane slicing of the raw padded image inside the
    # kernel would remove this glue entirely, but strided lane gathers do not lower
    # cleanly; the chain stays in XLA and is offered to the call via allow_input_fusion.
    xp = jnp.pad(x, ((0, 0), (0, 0), (PAD, PAD), (PAD, PAD)))
    cols = []
    for kh in range(KH):
        for kw in range(KW):
            cols.append(xp[:, :,
                           kh * DIL: kh * DIL + STRIDE * OH: STRIDE,
                           kw * DIL: kw * DIL + STRIDE * OW: STRIDE])  # (N, C, OH, OW)
    patches = jnp.stack(cols, axis=2)                     # (N, C, KH*KW, OH, OW)
    # rows ordered (c, kh, kw) -- matches weight.reshape(C_OUT, K); cols = (n, oh, ow)
    A = patches.transpose(1, 2, 0, 3, 4).reshape(K, NM)

    # TPU-friendly padding: K (+1 bias row) on sublanes, batch*spatial lane-dense
    K_pad = _round_up(K + 1, 8)          # 27 + 1 bias row -> 32
    NM_pad = _round_up(NM, 128)          # 441 -> 512 for the spec input
    CO_pad = _round_up(C_OUT, 8)         # 6 -> 8

    A_p = jnp.pad(A, ((0, K_pad - K), (0, NM_pad - NM)))
    A_p = A_p.at[K, :].set(1.0)          # constant-1 row that carries the bias

    W_p = jnp.zeros((CO_pad, K_pad), jnp.float32)
    W_p = W_p.at[:C_OUT, :K].set(weight.reshape(C_OUT, K).astype(jnp.float32))
    W_p = W_p.at[:C_OUT, K].set(bias.astype(jnp.float32))   # bias folded into column K

    cost = pl.CostEstimate(
        flops=2 * CO_pad * K_pad * NM_pad + 4 * CO_pad * NM_pad,
        transcendentals=0,
        bytes_accessed=(A_p.size + W_p.size + CO_pad * NM_pad) * 4,
    )

    out_p = pl.pallas_call(
        _fused_conv_kernel,
        out_shape=jax.ShapeDtypeStruct((CO_pad, NM_pad), jnp.float32),
        compiler_params=pltpu.CompilerParams(
            allow_input_fusion=[True, False]),   # fuse the im2col producer into the call
        cost_estimate=cost,
    )(A_p, W_p)

    # output is (C_OUT_pad, N*M_pad): slice padding, split batch, no per-pixel transpose
    out = out_p[:C_OUT, :NM].reshape(C_OUT, N, OH, OW).transpose(1, 0, 2, 3)
    return out


def _reference(x, weight, bias):
    t1 = lax.conv_general_dilated(
        x, weight, window_strides=(STRIDE, STRIDE),
        padding=((PAD, PAD), (PAD, PAD)), rhs_dilation=(DIL, DIL),
        dimension_numbers=("NCHW", "OIHW", "NCHW"))
    t1 = t1 + bias.reshape(1, -1, 1, 1)
    t2 = t1 / 2
    t3 = jnp.clip(t2, 0.0, 6.0)
    t4 = t1 + 2
    t5 = t4 * t3
    return t5 * 6.0


if __name__ == "__main__":
    key = jax.random.PRNGKey(0)
    kx, kw, kb = jax.random.split(key, 3)

    # input shape matches the PyTorch script: (1, 3, 64, 64)
    x = jax.random.normal(kx, (1, C_IN, 64, 64), dtype=jnp.float32)

    # deterministic parameter init (uniform, ~kaiming-like scale)
    fan_in = C_IN * KH * KW
    bound = 1.0 / (fan_in ** 0.5)
    weight = jax.random.uniform(kw, (C_OUT, C_IN, KH, KW),
                                minval=-bound, maxval=bound, dtype=jnp.float32)
    bias = jax.random.uniform(kb, (C_OUT,), minval=-bound, maxval=bound,
                              dtype=jnp.float32)

    out = jax.block_until_ready(model_forward(x, weight, bias))
    ref = jax.block_until_ready(_reference(x, weight, bias))

    assert out.shape == ref.shape == (1, C_OUT, 21, 21), out.shape
    assert jnp.allclose(out, ref, atol=1e-4, rtol=1e-4), \
        float(jnp.max(jnp.abs(out - ref)))

    print("KERNEL_OK")
</pallas_src>

<mosaic_0001>
module attributes {stable_mosaic.version = 11 : i64} {
  func.func @_fused_conv_kernel(%arg0: memref<32x512xf32, #tpu.memory_space<vmem>>, %arg1: memref<8x32xf32, #tpu.memory_space<vmem>>, %arg2: memref<8x512xf32, #tpu.memory_space<vmem>>) attributes {dimension_semantics = [], scalar_prefetch = 0 : i64, scratch_operands = 0 : i64, tpu.core_type = #tpu.core_type<tc>} {
    %c0 = arith.constant 0 : index
    %c0_0 = arith.constant 0 : index
    %0 = vector.load %arg1[%c0, %c0_0] : memref<8x32xf32, #tpu.memory_space<vmem>>, vector<8x32xf32>
    %c0_1 = arith.constant 0 : index
    %c0_2 = arith.constant 0 : index
    %1 = vector.load %arg0[%c0_1, %c0_2] : memref<32x512xf32, #tpu.memory_space<vmem>>, vector<32x512xf32>
    %cst = arith.constant dense<0.000000e+00> : vector<8x512xf32>
    %2 = tpu.matmul %0, %1, %cst {dimension_numbers = #tpu.dot_dimension_numbers<[1], [0], [0], [1], [0, 0, 1, 1], [], []>} : vector<8x32xf32>, vector<32x512xf32>, vector<8x512xf32> -> vector<8x512xf32>
    %cst_3 = arith.constant 3.000000e+00 : f32
    %3 = vector.broadcast %cst_3 : f32 to vector<8x512xf32>
    %4 = arith.mulf %2, %3 : vector<8x512xf32>
    %cst_4 = arith.constant 0.000000e+00 : f32
    %cst_5 = arith.constant 3.600000e+01 : f32
    %5 = vector.broadcast %cst_4 : f32 to vector<8x512xf32>
    %6 = arith.maximumf %5, %4 : vector<8x512xf32>
    %7 = vector.broadcast %cst_5 : f32 to vector<8x512xf32>
    %8 = arith.minimumf %7, %6 : vector<8x512xf32>
    %cst_6 = arith.constant 2.000000e+00 : f32
    %9 = vector.broadcast %cst_6 : f32 to vector<8x512xf32>
    %10 = arith.addf %2, %9 : vector<8x512xf32>
    %11 = arith.mulf %10, %8 : vector<8x512xf32>
    %c0_7 = arith.constant 0 : index
    %c0_8 = arith.constant 0 : index
    %12 = vector.load %arg2[%c0_7, %c0_8] : memref<8x512xf32, #tpu.memory_space<vmem>>, vector<8x512xf32>
    tpu.vector_store %arg2[%c0_7, %c0_8], %11 {strides = array<i32>} : memref<8x512xf32, #tpu.memory_space<vmem>>, vector<8x512xf32>,
    return
  }
}

</mosaic_0001>

<bundles_post_ra>
// kernel: model_forward.1
= control target key start
LH: loop header
LB: loop body
LE: loop exit
PB: predicated region body
PF: predicated region fallthrough
CT: control target
= control target key end

     0   :  { %vm28_vm0 = vcmask 261120   ;;  %s222_s0 = inlined_call_operand.vmem [shape: f32[32,512], index: 0, kind: input, shape index: {}]   ;;  %s223_s1 = inlined_call_operand.vmem [shape: f32[8,32], index: 1, kind: input, shape index: {}]   ;;  %s224_s2 = inlined_call_operand.vmem [shape: f32[8,512], index: 2, kind: output, shape index: {}]  }
   0x1   :  { %v26_v0 = vld [vmem:[%s222_s0 + $0x70] sm:$0xff]  ;;  %v27_v1 = vld [vmem:[%s222_s0 + $0x78] sm:$0xff]  ;;  %v24_v2 = vld [vmem:[%s222_s0 + $0x60] sm:$0xff] }
   0x2   :  { %84 = vmatpush.msra.mxu2 %v26_v0  ;;  %104 = vmatpush.msra.mxu3 %v27_v1  ;;  %v25_v3 = vld [vmem:[%s222_s0 + $0x68] sm:$0xff]  ;;  %v22_v4 = vld [vmem:[%s222_s0 + $0x50] sm:$0xff]  ;;  %v23_v5 = vld [vmem:[%s222_s0 + $0x58] sm:$0xff] }
   0x3   :  { %44 = vmatpush.msra.mxu0 %v24_v2  ;;  %64 = vmatpush.msra.mxu1 %v25_v3  ;;  %v20_v6 = vld [vmem:[%s222_s0 + $0x40] sm:$0xff]  ;;  %v21_v7 = vld [vmem:[%s222_s0 + $0x48] sm:$0xff]  ;;  %v18_v8 = vld [vmem:[%s222_s0 + $0x30] sm:$0xff] }
   0x4   :  { %85 = vmatpush.msra.mxu2 %v22_v4  ;;  %105 = vmatpush.msra.mxu3 %v23_v5  ;;  %v19_v9 = vld [vmem:[%s222_s0 + $0x38] sm:$0xff]  ;;  %v16_v10 = vld [vmem:[%s222_s0 + $0x20] sm:$0xff]  ;;  %v17_v11 = vld [vmem:[%s222_s0 + $0x28] sm:$0xff] }
   0x5   :  { %45 = vmatpush.msra.mxu0 %v20_v6  ;;  %65 = vmatpush.msra.mxu1 %v21_v7  ;;  %v14_v12 = vld [vmem:[%s222_s0 + $0x10] sm:$0xff]  ;;  %v15_v13 = vld [vmem:[%s222_s0 + $0x18] sm:$0xff]  ;;  %v11_v14 = vld [vmem:[%s223_s1] sm:$0xff] }
   0x6   :  { %86 = vmatpush.msra.mxu2 %v18_v8  ;;  %106 = vmatpush.msra.mxu3 %v19_v9  ;;  %v12_v15 = vld [vmem:[%s222_s0] sm:$0xff]  ;;  %v13_v16 = vld [vmem:[%s222_s0 + $0x8] sm:$0xff] }
   0x7   :  { %46 = vmatpush.msra.mxu0 %v16_v10  ;;  %66 = vmatpush.msra.mxu1 %v17_v11 }
   0x8   :  { %87 = vmatpush.msra.mxu2 %v14_v12  ;;  %107 = vmatpush.msra.mxu3 %v15_v13 }
   0x9   :  { %142 = vmatmul.msk.f32.vlgmr.msra.gmra.mxu2 %vm28_vm0, %v11_v14  ;;  %143 = vmatmul.msk.f32.vlgmr.msra.gmra.mxu3 %vm28_vm0, %v11_v14 }
   0xa   :  { %47 = vmatpush.msra.mxu0 %v12_v15  ;;  %67 = vmatpush.msra.mxu1 %v13_v16 }
   0xb   :  { %140 = vmatmul.msk.f32.vlgmr.msra.gmra.mxu0 %vm28_vm0, %v11_v14  ;;  %141 = vmatmul.msk.f32.vlgmr.msra.gmra.mxu1 %vm28_vm0, %v11_v14 }
  0x88   :  { %v49_v17 = vpop.f32.mrf.mxu0  ;;  %v69_v18 = vpop.f32.mrf.mxu1 }
  0x89   :  { %v112_v19 = vmul.f32 3.0, %v49_v17  ;;  %v113_v20 = vmul.f32 3.0, %v69_v18  ;;  %v124_v22 = vadd.f32 2.0, %v49_v17  ;;  %v125_v24 = vadd.f32 2.0, %v69_v18 }
  0x8b   :  { %v116_v21 = vmax.f32 %v112_v19, 0.0  ;;  %v117_v23 = vmax.f32 %v113_v20, 0.0 }
  0x8c   :  { %v89_v25 = vpop.f32.mrf.mxu2  ;;  %v109_v26 = vpop.f32.mrf.mxu3 }
  0x8d   :  { %v120_v27 = vmin.f32 %v116_v21, 36.0  ;;  %v121_v28 = vmin.f32 %v117_v23, 36.0  ;;  %v114_v29 = vmul.f32 3.0, %v89_v25  ;;  %v115_v30 = vmul.f32 3.0, %v109_v26 }
  0x8e   :  { %v126_v36 = vadd.f32 2.0, %v89_v25  ;;  %v127_v38 = vadd.f32 2.0, %v109_v26 }
  0x8f   :  { %v128_v31 = vmul.f32 %v124_v22, %v120_v27  ;;  %v129_v32 = vmul.f32 %v125_v24, %v121_v28  ;;  %v118_v33 = vmax.f32 %v114_v29, 0.0  ;;  %v119_v34 = vmax.f32 %v115_v30, 0.0 }
  0x91   :  { %132 = vst [vmem:[%s224_s2] sm:$0xff] %v128_v31  ;;  %v122_v35 = vmin.f32 %v118_v33, 36.0  ;;  %v123_v37 = vmin.f32 %v119_v34, 36.0 }
  0x92   :  { %133 = vst [vmem:[%s224_s2 + $0x8] sm:$0xff] %v129_v32 }
  0x93   :  { %v130_v39 = vmul.f32 %v126_v36, %v122_v35  ;;  %v131_v40 = vmul.f32 %v127_v38, %v123_v37 }
  0x95   :  { %134 = vst [vmem:[%s224_s2 + $0x10] sm:$0xff] %v130_v39 }
  0x96   :  { %135 = vst [vmem:[%s224_s2 + $0x18] sm:$0xff] %v131_v40 }

</bundles_post_ra>
